<compile_context>
chip_gen: v6e
topology: v6e:2x2x1
jax: 0.10.0
libtpu: 0.0.40
codegen_flags: <defaults>
</compile_context>

<pallas_src>
import jax
import jax.numpy as jnp
import numpy as np
from jax.experimental import pallas as pl
from jax.experimental.pallas import tpu as pltpu

C1, C2, K, PAD = 8, 16, 3, 2   # conv1 out-ch, conv2 out-ch, kernel size, padding (from __init__)
_HI = jax.lax.Precision.HIGHEST


def _bilinear_matrix(out_size, in_size):
    """Row-interpolation matrix matching F.interpolate(mode='bilinear', align_corners=False)."""
    scale = in_size / out_size
    src = (jnp.arange(out_size, dtype=jnp.float32) + 0.5) * scale - 0.5
    src = jnp.maximum(src, 0.0)                         # PyTorch clamps negative source index
    lo = jnp.clip(jnp.floor(src).astype(jnp.int32), 0, in_size - 1)
    hi = jnp.minimum(lo + 1, in_size - 1)
    frac = src - lo.astype(jnp.float32)
    eye = jnp.eye(in_size, dtype=jnp.float32)
    return eye[lo] * (1.0 - frac)[:, None] + eye[hi] * frac[:, None]    # (out_size, in_size)


def _make_kernel(Lpool):
    """conv1 + relu + maxpool(2) fused with the pre-folded (conv2+bilinear+cat3+fc) head.

    All arrays carry the batch tile Bt on the lane (last) axis.
    """
    def kernel(xe_ref, xo_ref, w1_ref, b1_ref, mf_ref, const_ref, o_ref, pool_ref):
        xe = xe_ref[...]                 # (Lh, Bt)  even positions of the zero-padded input
        xo = xo_ref[...]                 # (Lh, Bt)  odd  positions
        xe0 = xe[0:Lpool, :]
        xe1 = xe[1:Lpool + 1, :]
        xo0 = xo[0:Lpool, :]
        xo1 = xo[1:Lpool + 1, :]

        # conv1 (3 taps) evaluated at even/odd output positions so max_pool1d(2) is an
        # elementwise max; one (Lpool, Bt) slab per output channel, all Bt elems per op.
        for c in range(C1):              # static 8-iteration loop over conv1 channels
            k0 = w1_ref[c * K + 0]       # SMEM scalars -> broadcast multipliers
            k1 = w1_ref[c * K + 1]
            k2 = w1_ref[c * K + 2]
            bc = b1_ref[c]
            ev = k0 * xe0 + k1 * xo0 + k2 * xe1 + bc
            od = k0 * xo0 + k1 * xe1 + k2 * xo1 + bc
            pool_ref[c * Lpool:(c + 1) * Lpool, :] = jnp.maximum(
                jnp.maximum(ev, 0.0), jnp.maximum(od, 0.0))

        # folded conv2 + bilinear + cat3 + fc head: ONE MXU matmul (nc,72)x(72,Bt),
        # one broadcast add, one lane-dense store.
        o_ref[...] = (jnp.dot(mf_ref[...], pool_ref[...],
                              preferred_element_type=jnp.float32)
                      + const_ref[...])
    return kernel


def cnn_two_layers_forward(x, params, block_b=128):
    conv1_w, conv1_b = params["conv1_w"], params["conv1_b"]
    conv2_w, conv2_b = params["conv2_w"], params["conv2_b"]
    fc_w, fc_b = params["fc_w"], params["fc_b"]

    B, cin, L = x.shape
    assert cin == 1 and L % 2 == 0
    Lh = L // 2 + 2            # even/odd halves of the padded conv1 input
    Lpool = L // 2 + 1         # length after conv1(pad=2) + max_pool1d(2)
    Lout2 = Lpool + 2          # length after conv2(pad=2)
    num_classes = fc_w.shape[1]

    assert block_b % 128 == 0
    Bt = block_b               # batch tile on the lane axis (multiple of 128)
    Bp = pl.cdiv(B, Bt) * Bt

    # --- glue: input layout prep (zero pad, even/odd split, batch onto lanes) ----------------
    xpad = jnp.pad(x[:, 0, :], ((0, Bp - B), (PAD, PAD)))   # (Bp, L+4)
    xe = jnp.transpose(xpad[:, 0::2])                       # (Lh, Bp)
    xo = jnp.transpose(xpad[:, 1::2])                       # (Lh, Bp)

    # --- glue: weight-only precompute (no input data involved) -------------------------------
    w1s = conv1_w[:, 0, :].reshape(-1)                      # (C1*K,)  conv1 taps -> SMEM scalars
    b1s = conv1_b                                           # (C1,)

    # cat((out,out,out), dim=1) flattens channel-major, so the three fc_w row blocks simply sum;
    # the bilinear upsample (linear) is folded into that summed weight ...
    wh = _bilinear_matrix(L, C2)                            # (L, C2)    height interp
    ww = _bilinear_matrix(L, Lout2)                         # (L, Lout2) width interp
    fc_w_sum = fc_w[:L * L] + fc_w[L * L:2 * L * L] + fc_w[2 * L * L:]
    w3 = fc_w_sum.reshape(L, L, num_classes)
    M = jnp.einsum("ih,jw,ijn->nhw", wh, ww, w3, precision=_HI)   # (nc, C2, Lout2)

    # ... and conv2 (also linear) is folded in as well:
    #   logits[n,b] = const[n] + sum_{c1,t} Mfold[n,c1,t] * pooled[b,c1,t]
    A = jnp.einsum("nop,oik->nikp", M, conv2_w, precision=_HI)    # (nc, C1, K, Lout2)
    mfold = (A[:, :, 0, PAD:PAD + Lpool]                          # tap k=0
             + A[:, :, 1, PAD - 1:PAD - 1 + Lpool]                # tap k=1
             + A[:, :, 2, 0:Lpool])                               # tap k=2   -> (nc, C1, Lpool)
    mf = mfold.reshape(num_classes, C1 * Lpool)                   # 2-D lane-dense folded weight
    const = (fc_b + jnp.einsum("nop,o->n", M, conv2_b, precision=_HI))[:, None]   # (nc, 1)

    out = pl.pallas_call(
        _make_kernel(Lpool),
        out_shape=jax.ShapeDtypeStruct((num_classes, Bp), jnp.float32),
        grid=(Bp // Bt,),
        in_specs=[
            pl.BlockSpec((Lh, Bt), lambda i: (0, i)),                       # xe (batch on lanes)
            pl.BlockSpec((Lh, Bt), lambda i: (0, i)),                       # xo
            pl.BlockSpec(memory_space=pltpu.MemorySpace.SMEM),              # conv1 weight scalars
            pl.BlockSpec(memory_space=pltpu.MemorySpace.SMEM),              # conv1 bias scalars
            pl.BlockSpec((num_classes, C1 * Lpool), lambda i: (0, 0)),      # folded head weight
            pl.BlockSpec((num_classes, 1), lambda i: (0, 0)),               # folded constant
        ],
        out_specs=pl.BlockSpec((num_classes, Bt), lambda i: (0, i)),        # lane-dense logits
        scratch_shapes=[pltpu.VMEM((C1 * Lpool, Bt), jnp.float32)],         # pooled (72, Bt)
        compiler_params=pltpu.CompilerParams(dimension_semantics=("parallel",)),
    )(xe, xo, w1s, b1s, mf, const)

    return jnp.transpose(out[:, :B])                        # (B, num_classes)


def reference_forward(x, params):
    """Pure-JAX reference of the same forward (explicit conv/pool/bilinear/cat3/fc path)."""
    conv1_w, conv1_b = params["conv1_w"], params["conv1_b"]
    conv2_w, conv2_b = params["conv2_w"], params["conv2_b"]
    fc_w, fc_b = params["fc_w"], params["fc_b"]
    B, _, L = x.shape
    o = jax.lax.conv_general_dilated(x, conv1_w, (1,), [(PAD, PAD)],
                                     dimension_numbers=("NCH", "OIH", "NCH"), precision=_HI)
    o = jax.nn.relu(o + conv1_b[None, :, None])
    Lp = o.shape[-1] // 2
    o = jnp.maximum(o[:, :, 0:2 * Lp:2], o[:, :, 1:2 * Lp:2])
    o = jax.lax.conv_general_dilated(o, conv2_w, (1,), [(PAD, PAD)],
                                     dimension_numbers=("NCH", "OIH", "NCH"), precision=_HI)
    o = o + conv2_b[None, :, None]                                       # (B, 16, Lout2)
    wh = _bilinear_matrix(L, o.shape[1])
    ww = _bilinear_matrix(L, o.shape[2])
    up = jnp.einsum("ih,bhw,jw->bij", wh, o, ww, precision=_HI)          # (B, L, L)
    cat3 = jnp.concatenate([up[:, None]] * 3, axis=1)
    return jnp.dot(cat3.reshape(B, -1), fc_w, precision=_HI) + fc_b[None, :]


if __name__ == "__main__":
    # B=160 with Bt=128 -> Bp=256, 2 "parallel" grid steps (exercises the tiled grid / megacore).
    B, L, num_classes = 160, 16, 10
    key = jax.random.PRNGKey(0)
    ks = jax.random.split(key, 7)

    def u(k, shape, fan_in):
        bound = 1.0 / float(np.sqrt(fan_in))
        return jax.random.uniform(k, shape, jnp.float32, -bound, bound)

    params = {
        "conv1_w": u(ks[0], (C1, 1, K), 1 * K),
        "conv1_b": u(ks[1], (C1,), 1 * K),
        "conv2_w": u(ks[2], (C2, C1, K), C1 * K),
        "conv2_b": u(ks[3], (C2,), C1 * K),
        "fc_w":    u(ks[4], (3 * L * L, num_classes), 3 * L * L),
        "fc_b":    u(ks[5], (num_classes,), 3 * L * L),
    }
    x = jax.random.normal(ks[6], (B, 1, L), jnp.float32)

    fwd = jax.jit(lambda xx: cnn_two_layers_forward(xx, params))
    out = jax.block_until_ready(fwd(x))

    ref = reference_forward(x, params)
    # Tolerance tightened 5x vs. the previous version; the residual slack covers the
    # MXU's reduced-precision f32 passes for the in-kernel dot (the fold itself is exact).
    np.testing.assert_allclose(np.asarray(out), np.asarray(ref), rtol=2e-3, atol=2e-3)
    print("KERNEL_OK")
</pallas_src>

<mosaic_0001>
module attributes {stable_mosaic.version = 11 : i64} {
  func.func @kernel(%arg0: i32, %arg1: memref<10x128xf32, #tpu.memory_space<vmem>>, %arg2: memref<10x128xf32, #tpu.memory_space<vmem>>, %arg3: memref<24xf32, #tpu.memory_space<smem>>, %arg4: memref<8xf32, #tpu.memory_space<smem>>, %arg5: memref<10x72xf32, #tpu.memory_space<vmem>>, %arg6: memref<10x1xf32, #tpu.memory_space<vmem>>, %arg7: memref<10x128xf32, #tpu.memory_space<vmem>>, %arg8: memref<72x128xf32, #tpu.memory_space<vmem>>) attributes {dimension_semantics = [#tpu.dimension_semantics<parallel>], iteration_bounds = array<i64: 2>, scalar_prefetch = 0 : i64, scratch_operands = 1 : i64, tpu.core_type = #tpu.core_type<tc>, window_params = [{transform_indices = @transform_0, window_bounds = array<i64: 10, 128>}, {transform_indices = @transform_1, window_bounds = array<i64: 10, 128>}, {transform_indices = @transform_2, window_bounds = array<i64: 24>}, {transform_indices = @transform_3, window_bounds = array<i64: 8>}, {pipeline_mode = #tpu.pipeline_mode<synchronous>, transform_indices = @transform_4, window_bounds = array<i64: 10, 72>}, {pipeline_mode = #tpu.pipeline_mode<synchronous>, transform_indices = @transform_5, window_bounds = array<i64: 10, 1>}, {transform_indices = @transform_6, window_bounds = array<i64: 10, 128>}]} {
    %c0 = arith.constant 0 : index
    %c0_0 = arith.constant 0 : index
    %0 = vector.load %arg1[%c0, %c0_0] : memref<10x128xf32, #tpu.memory_space<vmem>>, vector<10x128xf32>
    %c0_1 = arith.constant 0 : index
    %c0_2 = arith.constant 0 : index
    %1 = vector.load %arg2[%c0_1, %c0_2] : memref<10x128xf32, #tpu.memory_space<vmem>>, vector<10x128xf32>
    %2 = vector.extract_strided_slice %0 {offsets = [0, 0], sizes = [9, 128], strides = [1, 1]} : vector<10x128xf32> to vector<9x128xf32>
    %3 = vector.extract_strided_slice %0 {offsets = [1, 0], sizes = [9, 128], strides = [1, 1]} : vector<10x128xf32> to vector<9x128xf32>
    %4 = vector.extract_strided_slice %1 {offsets = [0, 0], sizes = [9, 128], strides = [1, 1]} : vector<10x128xf32> to vector<9x128xf32>
    %5 = vector.extract_strided_slice %1 {offsets = [1, 0], sizes = [9, 128], strides = [1, 1]} : vector<10x128xf32> to vector<9x128xf32>
    %c0_3 = arith.constant 0 : index
    %6 = memref.load %arg3[%c0_3] : memref<24xf32, #tpu.memory_space<smem>>
    %c1 = arith.constant 1 : index
    %7 = memref.load %arg3[%c1] : memref<24xf32, #tpu.memory_space<smem>>
    %c2 = arith.constant 2 : index
    %8 = memref.load %arg3[%c2] : memref<24xf32, #tpu.memory_space<smem>>
    %c0_4 = arith.constant 0 : index
    %9 = memref.load %arg4[%c0_4] : memref<8xf32, #tpu.memory_space<smem>>
    %10 = vector.broadcast %6 : f32 to vector<9x128xf32>
    %11 = arith.mulf %10, %2 : vector<9x128xf32>
    %12 = vector.broadcast %7 : f32 to vector<9x128xf32>
    %13 = arith.mulf %12, %4 : vector<9x128xf32>
    %14 = arith.addf %11, %13 : vector<9x128xf32>
    %15 = vector.broadcast %8 : f32 to vector<9x128xf32>
    %16 = arith.mulf %15, %3 : vector<9x128xf32>
    %17 = arith.addf %14, %16 : vector<9x128xf32>
    %18 = vector.broadcast %9 : f32 to vector<9x128xf32>
    %19 = arith.addf %17, %18 : vector<9x128xf32>
    %20 = vector.broadcast %6 : f32 to vector<9x128xf32>
    %21 = arith.mulf %20, %4 : vector<9x128xf32>
    %22 = vector.broadcast %7 : f32 to vector<9x128xf32>
    %23 = arith.mulf %22, %3 : vector<9x128xf32>
    %24 = arith.addf %21, %23 : vector<9x128xf32>
    %25 = vector.broadcast %8 : f32 to vector<9x128xf32>
    %26 = arith.mulf %25, %5 : vector<9x128xf32>
    %27 = arith.addf %24, %26 : vector<9x128xf32>
    %28 = vector.broadcast %9 : f32 to vector<9x128xf32>
    %29 = arith.addf %27, %28 : vector<9x128xf32>
    %cst = arith.constant 0.000000e+00 : f32
    %30 = vector.broadcast %cst : f32 to vector<9x128xf32>
    %31 = arith.maximumf %19, %30 : vector<9x128xf32>
    %cst_5 = arith.constant 0.000000e+00 : f32
    %32 = vector.broadcast %cst_5 : f32 to vector<9x128xf32>
    %33 = arith.maximumf %29, %32 : vector<9x128xf32>
    %34 = arith.maximumf %31, %33 : vector<9x128xf32>
    %c0_6 = arith.constant 0 : index
    %c0_7 = arith.constant 0 : index
    %35 = vector.load %arg8[%c0_6, %c0_7] : memref<72x128xf32, #tpu.memory_space<vmem>>, vector<9x128xf32>
    tpu.vector_store %arg8[%c0_6, %c0_7], %34 {strides = array<i32>} : memref<72x128xf32, #tpu.memory_space<vmem>>, vector<9x128xf32>,
    %c3 = arith.constant 3 : index
    %36 = memref.load %arg3[%c3] : memref<24xf32, #tpu.memory_space<smem>>
    %c4 = arith.constant 4 : index
    %37 = memref.load %arg3[%c4] : memref<24xf32, #tpu.memory_space<smem>>
    %c5 = arith.constant 5 : index
    %38 = memref.load %arg3[%c5] : memref<24xf32, #tpu.memory_space<smem>>
    %c1_8 = arith.constant 1 : index
    %39 = memref.load %arg4[%c1_8] : memref<8xf32, #tpu.memory_space<smem>>
    %40 = vector.broadcast %36 : f32 to vector<9x128xf32>
    %41 = arith.mulf %40, %2 : vector<9x128xf32>
    %42 = vector.broadcast %37 : f32 to vector<9x128xf32>
    %43 = arith.mulf %42, %4 : vector<9x128xf32>
    %44 = arith.addf %41, %43 : vector<9x128xf32>
    %45 = vector.broadcast %38 : f32 to vector<9x128xf32>
    %46 = arith.mulf %45, %3 : vector<9x128xf32>
    %47 = arith.addf %44, %46 : vector<9x128xf32>
    %48 = vector.broadcast %39 : f32 to vector<9x128xf32>
    %49 = arith.addf %47, %48 : vector<9x128xf32>
    %50 = vector.broadcast %36 : f32 to vector<9x128xf32>
    %51 = arith.mulf %50, %4 : vector<9x128xf32>
    %52 = vector.broadcast %37 : f32 to vector<9x128xf32>
    %53 = arith.mulf %52, %3 : vector<9x128xf32>
    %54 = arith.addf %51, %53 : vector<9x128xf32>
    %55 = vector.broadcast %38 : f32 to vector<9x128xf32>
    %56 = arith.mulf %55, %5 : vector<9x128xf32>
    %57 = arith.addf %54, %56 : vector<9x128xf32>
    %58 = vector.broadcast %39 : f32 to vector<9x128xf32>
    %59 = arith.addf %57, %58 : vector<9x128xf32>
    %cst_9 = arith.constant 0.000000e+00 : f32
    %60 = vector.broadcast %cst_9 : f32 to vector<9x128xf32>
    %61 = arith.maximumf %49, %60 : vector<9x128xf32>
    %cst_10 = arith.constant 0.000000e+00 : f32
    %62 = vector.broadcast %cst_10 : f32 to vector<9x128xf32>
    %63 = arith.maximumf %59, %62 : vector<9x128xf32>
    %64 = arith.maximumf %61, %63 : vector<9x128xf32>
    %c9 = arith.constant 9 : index
    %c0_11 = arith.constant 0 : index
    %65 = vector.load %arg8[%c9, %c0_11] : memref<72x128xf32, #tpu.memory_space<vmem>>, vector<9x128xf32>
    tpu.vector_store %arg8[%c9, %c0_11], %64 {strides = array<i32>} : memref<72x128xf32, #tpu.memory_space<vmem>>, vector<9x128xf32>,
    %c6 = arith.constant 6 : index
    %66 = memref.load %arg3[%c6] : memref<24xf32, #tpu.memory_space<smem>>
    %c7 = arith.constant 7 : index
    %67 = memref.load %arg3[%c7] : memref<24xf32, #tpu.memory_space<smem>>
    %c8 = arith.constant 8 : index
    %68 = memref.load %arg3[%c8] : memref<24xf32, #tpu.memory_space<smem>>
    %c2_12 = arith.constant 2 : index
    %69 = memref.load %arg4[%c2_12] : memref<8xf32, #tpu.memory_space<smem>>
    %70 = vector.broadcast %66 : f32 to vector<9x128xf32>
    %71 = arith.mulf %70, %2 : vector<9x128xf32>
    %72 = vector.broadcast %67 : f32 to vector<9x128xf32>
    %73 = arith.mulf %72, %4 : vector<9x128xf32>
    %74 = arith.addf %71, %73 : vector<9x128xf32>
    %75 = vector.broadcast %68 : f32 to vector<9x128xf32>
    %76 = arith.mulf %75, %3 : vector<9x128xf32>
    %77 = arith.addf %74, %76 : vector<9x128xf32>
    %78 = vector.broadcast %69 : f32 to vector<9x128xf32>
    %79 = arith.addf %77, %78 : vector<9x128xf32>
    %80 = vector.broadcast %66 : f32 to vector<9x128xf32>
    %81 = arith.mulf %80, %4 : vector<9x128xf32>
    %82 = vector.broadcast %67 : f32 to vector<9x128xf32>
    %83 = arith.mulf %82, %3 : vector<9x128xf32>
    %84 = arith.addf %81, %83 : vector<9x128xf32>
    %85 = vector.broadcast %68 : f32 to vector<9x128xf32>
    %86 = arith.mulf %85, %5 : vector<9x128xf32>
    %87 = arith.addf %84, %86 : vector<9x128xf32>
    %88 = vector.broadcast %69 : f32 to vector<9x128xf32>
    %89 = arith.addf %87, %88 : vector<9x128xf32>
    %cst_13 = arith.constant 0.000000e+00 : f32
    %90 = vector.broadcast %cst_13 : f32 to vector<9x128xf32>
    %91 = arith.maximumf %79, %90 : vector<9x128xf32>
    %cst_14 = arith.constant 0.000000e+00 : f32
    %92 = vector.broadcast %cst_14 : f32 to vector<9x128xf32>
    %93 = arith.maximumf %89, %92 : vector<9x128xf32>
    %94 = arith.maximumf %91, %93 : vector<9x128xf32>
    %c18 = arith.constant 18 : index
    %c0_15 = arith.constant 0 : index
    %95 = vector.load %arg8[%c18, %c0_15] : memref<72x128xf32, #tpu.memory_space<vmem>>, vector<9x128xf32>
    tpu.vector_store %arg8[%c18, %c0_15], %94 {strides = array<i32>} : memref<72x128xf32, #tpu.memory_space<vmem>>, vector<9x128xf32>,
    %c9_16 = arith.constant 9 : index
    %96 = memref.load %arg3[%c9_16] : memref<24xf32, #tpu.memory_space<smem>>
    %c10 = arith.constant 10 : index
    %97 = memref.load %arg3[%c10] : memref<24xf32, #tpu.memory_space<smem>>
    %c11 = arith.constant 11 : index
    %98 = memref.load %arg3[%c11] : memref<24xf32, #tpu.memory_space<smem>>
    %c3_17 = arith.constant 3 : index
    %99 = memref.load %arg4[%c3_17] : memref<8xf32, #tpu.memory_space<smem>>
    %100 = vector.broadcast %96 : f32 to vector<9x128xf32>
    %101 = arith.mulf %100, %2 : vector<9x128xf32>
    %102 = vector.broadcast %97 : f32 to vector<9x128xf32>
    %103 = arith.mulf %102, %4 : vector<9x128xf32>
    %104 = arith.addf %101, %103 : vector<9x128xf32>
    %105 = vector.broadcast %98 : f32 to vector<9x128xf32>
    %106 = arith.mulf %105, %3 : vector<9x128xf32>
    %107 = arith.addf %104, %106 : vector<9x128xf32>
    %108 = vector.broadcast %99 : f32 to vector<9x128xf32>
    %109 = arith.addf %107, %108 : vector<9x128xf32>
    %110 = vector.broadcast %96 : f32 to vector<9x128xf32>
    %111 = arith.mulf %110, %4 : vector<9x128xf32>
    %112 = vector.broadcast %97 : f32 to vector<9x128xf32>
    %113 = arith.mulf %112, %3 : vector<9x128xf32>
    %114 = arith.addf %111, %113 : vector<9x128xf32>
    %115 = vector.broadcast %98 : f32 to vector<9x128xf32>
    %116 = arith.mulf %115, %5 : vector<9x128xf32>
    %117 = arith.addf %114, %116 : vector<9x128xf32>
    %118 = vector.broadcast %99 : f32 to vector<9x128xf32>
    %119 = arith.addf %117, %118 : vector<9x128xf32>
    %cst_18 = arith.constant 0.000000e+00 : f32
    %120 = vector.broadcast %cst_18 : f32 to vector<9x128xf32>
    %121 = arith.maximumf %109, %120 : vector<9x128xf32>
    %cst_19 = arith.constant 0.000000e+00 : f32
    %122 = vector.broadcast %cst_19 : f32 to vector<9x128xf32>
    %123 = arith.maximumf %119, %122 : vector<9x128xf32>
    %124 = arith.maximumf %121, %123 : vector<9x128xf32>
    %c27 = arith.constant 27 : index
    %c0_20 = arith.constant 0 : index
    %125 = vector.load %arg8[%c27, %c0_20] : memref<72x128xf32, #tpu.memory_space<vmem>>, vector<9x128xf32>
    tpu.vector_store %arg8[%c27, %c0_20], %124 {strides = array<i32>} : memref<72x128xf32, #tpu.memory_space<vmem>>, vector<9x128xf32>,
    %c12 = arith.constant 12 : index
    %126 = memref.load %arg3[%c12] : memref<24xf32, #tpu.memory_space<smem>>
    %c13 = arith.constant 13 : index
    %127 = memref.load %arg3[%c13] : memref<24xf32, #tpu.memory_space<smem>>
    %c14 = arith.constant 14 : index
    %128 = memref.load %arg3[%c14] : memref<24xf32, #tpu.memory_space<smem>>
    %c4_21 = arith.constant 4 : index
    %129 = memref.load %arg4[%c4_21] : memref<8xf32, #tpu.memory_space<smem>>
    %130 = vector.broadcast %126 : f32 to vector<9x128xf32>
    %131 = arith.mulf %130, %2 : vector<9x128xf32>
    %132 = vector.broadcast %127 : f32 to vector<9x128xf32>
    %133 = arith.mulf %132, %4 : vector<9x128xf32>
    %134 = arith.addf %131, %133 : vector<9x128xf32>
    %135 = vector.broadcast %128 : f32 to vector<9x128xf32>
    %136 = arith.mulf %135, %3 : vector<9x128xf32>
    %137 = arith.addf %134, %136 : vector<9x128xf32>
    %138 = vector.broadcast %129 : f32 to vector<9x128xf32>
    %139 = arith.addf %137, %138 : vector<9x128xf32>
    %140 = vector.broadcast %126 : f32 to vector<9x128xf32>
    %141 = arith.mulf %140, %4 : vector<9x128xf32>
    %142 = vector.broadcast %127 : f32 to vector<9x128xf32>
    %143 = arith.mulf %142, %3 : vector<9x128xf32>
    %144 = arith.addf %141, %143 : vector<9x128xf32>
    %145 = vector.broadcast %128 : f32 to vector<9x128xf32>
    %146 = arith.mulf %145, %5 : vector<9x128xf32>
    %147 = arith.addf %144, %146 : vector<9x128xf32>
    %148 = vector.broadcast %129 : f32 to vector<9x128xf32>
    %149 = arith.addf %147, %148 : vector<9x128xf32>
    %cst_22 = arith.constant 0.000000e+00 : f32
    %150 = vector.broadcast %cst_22 : f32 to vector<9x128xf32>
    %151 = arith.maximumf %139, %150 : vector<9x128xf32>
    %cst_23 = arith.constant 0.000000e+00 : f32
    %152 = vector.broadcast %cst_23 : f32 to vector<9x128xf32>
    %153 = arith.maximumf %149, %152 : vector<9x128xf32>
    %154 = arith.maximumf %151, %153 : vector<9x128xf32>
    %c36 = arith.constant 36 : index
    %c0_24 = arith.constant 0 : index
    %155 = vector.load %arg8[%c36, %c0_24] : memref<72x128xf32, #tpu.memory_space<vmem>>, vector<9x128xf32>
    tpu.vector_store %arg8[%c36, %c0_24], %154 {strides = array<i32>} : memref<72x128xf32, #tpu.memory_space<vmem>>, vector<9x128xf32>,
    %c15 = arith.constant 15 : index
    %156 = memref.load %arg3[%c15] : memref<24xf32, #tpu.memory_space<smem>>
    %c16 = arith.constant 16 : index
    %157 = memref.load %arg3[%c16] : memref<24xf32, #tpu.memory_space<smem>>
    %c17 = arith.constant 17 : index
    %158 = memref.load %arg3[%c17] : memref<24xf32, #tpu.memory_space<smem>>
    %c5_25 = arith.constant 5 : index
    %159 = memref.load %arg4[%c5_25] : memref<8xf32, #tpu.memory_space<smem>>
    %160 = vector.broadcast %156 : f32 to vector<9x128xf32>
    %161 = arith.mulf %160, %2 : vector<9x128xf32>
    %162 = vector.broadcast %157 : f32 to vector<9x128xf32>
    %163 = arith.mulf %162, %4 : vector<9x128xf32>
    %164 = arith.addf %161, %163 : vector<9x128xf32>
    %165 = vector.broadcast %158 : f32 to vector<9x128xf32>
    %166 = arith.mulf %165, %3 : vector<9x128xf32>
    %167 = arith.addf %164, %166 : vector<9x128xf32>
    %168 = vector.broadcast %159 : f32 to vector<9x128xf32>
    %169 = arith.addf %167, %168 : vector<9x128xf32>
    %170 = vector.broadcast %156 : f32 to vector<9x128xf32>
    %171 = arith.mulf %170, %4 : vector<9x128xf32>
    %172 = vector.broadcast %157 : f32 to vector<9x128xf32>
    %173 = arith.mulf %172, %3 : vector<9x128xf32>
    %174 = arith.addf %171, %173 : vector<9x128xf32>
    %175 = vector.broadcast %158 : f32 to vector<9x128xf32>
    %176 = arith.mulf %175, %5 : vector<9x128xf32>
    %177 = arith.addf %174, %176 : vector<9x128xf32>
    %178 = vector.broadcast %159 : f32 to vector<9x128xf32>
    %179 = arith.addf %177, %178 : vector<9x128xf32>
    %cst_26 = arith.constant 0.000000e+00 : f32
    %180 = vector.broadcast %cst_26 : f32 to vector<9x128xf32>
    %181 = arith.maximumf %169, %180 : vector<9x128xf32>
    %cst_27 = arith.constant 0.000000e+00 : f32
    %182 = vector.broadcast %cst_27 : f32 to vector<9x128xf32>
    %183 = arith.maximumf %179, %182 : vector<9x128xf32>
    %184 = arith.maximumf %181, %183 : vector<9x128xf32>
    %c45 = arith.constant 45 : index
    %c0_28 = arith.constant 0 : index
    %185 = vector.load %arg8[%c45, %c0_28] : memref<72x128xf32, #tpu.memory_space<vmem>>, vector<9x128xf32>
    tpu.vector_store %arg8[%c45, %c0_28], %184 {strides = array<i32>} : memref<72x128xf32, #tpu.memory_space<vmem>>, vector<9x128xf32>,
    %c18_29 = arith.constant 18 : index
    %186 = memref.load %arg3[%c18_29] : memref<24xf32, #tpu.memory_space<smem>>
    %c19 = arith.constant 19 : index
    %187 = memref.load %arg3[%c19] : memref<24xf32, #tpu.memory_space<smem>>
    %c20 = arith.constant 20 : index
    %188 = memref.load %arg3[%c20] : memref<24xf32, #tpu.memory_space<smem>>
    %c6_30 = arith.constant 6 : index
    %189 = memref.load %arg4[%c6_30] : memref<8xf32, #tpu.memory_space<smem>>
    %190 = vector.broadcast %186 : f32 to vector<9x128xf32>
    %191 = arith.mulf %190, %2 : vector<9x128xf32>
    %192 = vector.broadcast %187 : f32 to vector<9x128xf32>
    %193 = arith.mulf %192, %4 : vector<9x128xf32>
    %194 = arith.addf %191, %193 : vector<9x128xf32>
    %195 = vector.broadcast %188 : f32 to vector<9x128xf32>
    %196 = arith.mulf %195, %3 : vector<9x128xf32>
    %197 = arith.addf %194, %196 : vector<9x128xf32>
    %198 = vector.broadcast %189 : f32 to vector<9x128xf32>
    %199 = arith.addf %197, %198 : vector<9x128xf32>
    %200 = vector.broadcast %186 : f32 to vector<9x128xf32>
    %201 = arith.mulf %200, %4 : vector<9x128xf32>
    %202 = vector.broadcast %187 : f32 to vector<9x128xf32>
    %203 = arith.mulf %202, %3 : vector<9x128xf32>
    %204 = arith.addf %201, %203 : vector<9x128xf32>
    %205 = vector.broadcast %188 : f32 to vector<9x128xf32>
    %206 = arith.mulf %205, %5 : vector<9x128xf32>
    %207 = arith.addf %204, %206 : vector<9x128xf32>
    %208 = vector.broadcast %189 : f32 to vector<9x128xf32>
    %209 = arith.addf %207, %208 : vector<9x128xf32>
    %cst_31 = arith.constant 0.000000e+00 : f32
    %210 = vector.broadcast %cst_31 : f32 to vector<9x128xf32>
    %211 = arith.maximumf %199, %210 : vector<9x128xf32>
    %cst_32 = arith.constant 0.000000e+00 : f32
    %212 = vector.broadcast %cst_32 : f32 to vector<9x128xf32>
    %213 = arith.maximumf %209, %212 : vector<9x128xf32>
    %214 = arith.maximumf %211, %213 : vector<9x128xf32>
    %c54 = arith.constant 54 : index
    %c0_33 = arith.constant 0 : index
    %215 = vector.load %arg8[%c54, %c0_33] : memref<72x128xf32, #tpu.memory_space<vmem>>, vector<9x128xf32>
    tpu.vector_store %arg8[%c54, %c0_33], %214 {strides = array<i32>} : memref<72x128xf32, #tpu.memory_space<vmem>>, vector<9x128xf32>,
    %c21 = arith.constant 21 : index
    %216 = memref.load %arg3[%c21] : memref<24xf32, #tpu.memory_space<smem>>
    %c22 = arith.constant 22 : index
    %217 = memref.load %arg3[%c22] : memref<24xf32, #tpu.memory_space<smem>>
    %c23 = arith.constant 23 : index
    %218 = memref.load %arg3[%c23] : memref<24xf32, #tpu.memory_space<smem>>
    %c7_34 = arith.constant 7 : index
    %219 = memref.load %arg4[%c7_34] : memref<8xf32, #tpu.memory_space<smem>>
    %220 = vector.broadcast %216 : f32 to vector<9x128xf32>
    %221 = arith.mulf %220, %2 : vector<9x128xf32>
    %222 = vector.broadcast %217 : f32 to vector<9x128xf32>
    %223 = arith.mulf %222, %4 : vector<9x128xf32>
    %224 = arith.addf %221, %223 : vector<9x128xf32>
    %225 = vector.broadcast %218 : f32 to vector<9x128xf32>
    %226 = arith.mulf %225, %3 : vector<9x128xf32>
    %227 = arith.addf %224, %226 : vector<9x128xf32>
    %228 = vector.broadcast %219 : f32 to vector<9x128xf32>
    %229 = arith.addf %227, %228 : vector<9x128xf32>
    %230 = vector.broadcast %216 : f32 to vector<9x128xf32>
    %231 = arith.mulf %230, %4 : vector<9x128xf32>
    %232 = vector.broadcast %217 : f32 to vector<9x128xf32>
    %233 = arith.mulf %232, %3 : vector<9x128xf32>
    %234 = arith.addf %231, %233 : vector<9x128xf32>
    %235 = vector.broadcast %218 : f32 to vector<9x128xf32>
    %236 = arith.mulf %235, %5 : vector<9x128xf32>
    %237 = arith.addf %234, %236 : vector<9x128xf32>
    %238 = vector.broadcast %219 : f32 to vector<9x128xf32>
    %239 = arith.addf %237, %238 : vector<9x128xf32>
    %cst_35 = arith.constant 0.000000e+00 : f32
    %240 = vector.broadcast %cst_35 : f32 to vector<9x128xf32>
    %241 = arith.maximumf %229, %240 : vector<9x128xf32>
    %cst_36 = arith.constant 0.000000e+00 : f32
    %242 = vector.broadcast %cst_36 : f32 to vector<9x128xf32>
    %243 = arith.maximumf %239, %242 : vector<9x128xf32>
    %244 = arith.maximumf %241, %243 : vector<9x128xf32>
    %c63 = arith.constant 63 : index
    %c0_37 = arith.constant 0 : index
    %245 = vector.load %arg8[%c63, %c0_37] : memref<72x128xf32, #tpu.memory_space<vmem>>, vector<9x128xf32>
    tpu.vector_store %arg8[%c63, %c0_37], %244 {strides = array<i32>} : memref<72x128xf32, #tpu.memory_space<vmem>>, vector<9x128xf32>,
    %c0_38 = arith.constant 0 : index
    %c0_39 = arith.constant 0 : index
    %246 = vector.load %arg5[%c0_38, %c0_39] : memref<10x72xf32, #tpu.memory_space<vmem>>, vector<10x72xf32>
    %c0_40 = arith.constant 0 : index
    %c0_41 = arith.constant 0 : index
    %247 = vector.load %arg8[%c0_40, %c0_41] : memref<72x128xf32, #tpu.memory_space<vmem>>, vector<72x128xf32>
    %cst_42 = arith.constant dense<0.000000e+00> : vector<10x128xf32>
    %248 = tpu.matmul %246, %247, %cst_42 {dimension_numbers = #tpu.dot_dimension_numbers<[1], [0], [0], [1], [0, 0, 1, 1], [], []>} : vector<10x72xf32>, vector<72x128xf32>, vector<10x128xf32> -> vector<10x128xf32>
    %c0_43 = arith.constant 0 : index
    %c0_44 = arith.constant 0 : index
    %249 = vector.load %arg6[%c0_43, %c0_44] : memref<10x1xf32, #tpu.memory_space<vmem>>, vector<10x1xf32>
    %250 = vector.broadcast %249 : vector<10x1xf32> to vector<10x128xf32>
    %251 = arith.addf %248, %250 : vector<10x128xf32>
    %c0_45 = arith.constant 0 : index
    %c0_46 = arith.constant 0 : index
    %252 = vector.load %arg7[%c0_45, %c0_46] : memref<10x128xf32, #tpu.memory_space<vmem>>, vector<10x128xf32>
    tpu.vector_store %arg7[%c0_45, %c0_46], %251 {strides = array<i32>} : memref<10x128xf32, #tpu.memory_space<vmem>>, vector<10x128xf32>,
    return
  }
  func.func @transform_0(%arg0: i32) -> (i32, i32) {
    %c0_i32 = arith.constant 0 : i32
    %c0_i32_0 = arith.constant 0 : i32
    return %c0_i32, %arg0 : i32, i32
  }
  func.func @transform_1(%arg0: i32) -> (i32, i32) {
    %c0_i32 = arith.constant 0 : i32
    %c0_i32_0 = arith.constant 0 : i32
    return %c0_i32, %arg0 : i32, i32
  }
  func.func @transform_2(%arg0: i32) -> i32 {
    %c0_i32 = arith.constant 0 : i32
    %c0_i32_0 = arith.constant 0 : i32
    return %c0_i32 : i32
  }
  func.func @transform_3(%arg0: i32) -> i32 {
    %c0_i32 = arith.constant 0 : i32
    %c0_i32_0 = arith.constant 0 : i32
    return %c0_i32 : i32
  }
  func.func @transform_4(%arg0: i32) -> (i32, i32) {
    %c0_i32 = arith.constant 0 : i32
    %c0_i32_0 = arith.constant 0 : i32
    %c0_i32_1 = arith.constant 0 : i32
    return %c0_i32, %c0_i32_0 : i32, i32
  }
  func.func @transform_5(%arg0: i32) -> (i32, i32) {
    %c0_i32 = arith.constant 0 : i32
    %c0_i32_0 = arith.constant 0 : i32
    %c0_i32_1 = arith.constant 0 : i32
    return %c0_i32, %c0_i32_0 : i32, i32
  }
  func.func @transform_6(%arg0: i32) -> (i32, i32) {
    %c0_i32 = arith.constant 0 : i32
    %c0_i32_0 = arith.constant 0 : i32
    return %c0_i32, %arg0 : i32, i32
  }
}

</mosaic_0001>

<bundles_post_ra>
// kernel: _lambda_.1
= control target key start
LH: loop header
LB: loop body
LE: loop exit
PB: predicated region body
PF: predicated region fallthrough
CT: control target
= control target key end

     0   :  { %11 = vsyncpa [#allocation6], 0  ;;  %s1689_s0 = inlined_call_operand.vmem [shape: f32[10,256], index: 0, kind: input, shape index: {}]   ;;  %s1690_s1 = inlined_call_operand.vmem [shape: f32[10,256], index: 1, kind: input, shape index: {}]   ;;  %s1691_s2 = inlined_call_operand.vmem [shape: f32[24], index: 2, kind: input, shape index: {}]   ;;  %s1692_s3 = inlined_call_operand.vmem [shape: f32[8], index: 3, kind: input, shape index: {}]   ;;  %s1693_s4 = inlined_call_operand.vmem [shape: f32[10,72], index: 4, kind: input, shape index: {}]   ;;  %s1694_s5 = inlined_call_operand.vmem [shape: f32[10,1], index: 5, kind: input, shape index: {}]   ;;  %s1695_s6 = inlined_call_operand.vmem [shape: f32[10,256], index: 6, kind: output, shape index: {}]  }
   0x1   :  { %12 = vsyncpa [#allocation8], 0  ;;  %s1344_s21 = smov 0   ;;  %s1346_s22 = smov 0  }
   0x2   :  { %s1348_s23 = smov 0  }
   0x3 LB: > { %s1360_s24 = sadd.s32 4294967295, %s1304_s23   ;;  %s1363_s25 = sadd.s32 1, %s1304_s23   ;;  %s1304_s23 = sphi %s1348_s23, %s1712_s23   ;;  %s1300_s22 = sphi %s1346_s22, %s1711_s22   ;;  %s1296_s21 = sphi %s1344_s21, %s1710_s21  }
   0x4   : > { %s22_s26 = ssub.s32 %s1304_s23, %s1363_s25  ;;  %s25_s27 = sadd.s32 1, %s1300_s22 }
   0x5   : > { %p23_p0 = scmp.eq.s32.totalorder %s22_s26, 0  ;;  %p32_p1 = scmp.ne.s32.totalorder %s1300_s22, %s1296_s21 }
   0x6   : > { %p33_p2 = scmp.eq.s32.totalorder %s1304_s23, 0  ;;  %p172_p3 = scmp.eq.s32.totalorder %s1360_s24, 1 }
   0x7   : > { %s1373_s28 = scalar_select %p23_p0, %s1300_s22, %s25_s27  }
   0x8   : > { %p1375_p4 = por %p33_p2, %p32_p1  ;;  %p1379_p5 = por %p172_p3, %p32_p1 }
   0x9   : > { %p1115_p6 = scmp.ge.s32.totalorder %s1304_s23, 1  ;;  %p185_p7 = scmp.lt.s32.totalorder %s1304_s23, 3 }
   0xa   : > { %s1698_s29 = scalar_select %p1375_p4, 1, 0 }
   0xb   : > { %s1699_s30 = scalar_select %p1379_p5, 1, 0 }
   0xc   : > { %p1696_p8 = scmp.eq.s32.totalorder %s1360_s24, 0  ;;  %p1386_p9 = pnand %p1115_p6, %p185_p7 }
   0xd   : > { %s198_s10 = sshll.u32 %s1691_s2, 4  ;;  %s209_s13 = sshll.u32 %s1692_s3, 4  ;;  %s199_s10 = int_to_ptr.vmem [resolvable:$true] %s198_s10  ;;  %s210_s13 = int_to_ptr.vmem [resolvable:$true] %s209_s13 }
   0xe   : > { %s1700_s7 = scalar_select %p1386_p9, 1, 0 }
   0xf   : > { %p1205_p10 = pneg %p1386_p9  ;;  %s1244_s15 = scalar_lea.vmem %s199_s10, 16 }
  0x10   : > { %p1245_p12 = scmp.ne.s32.totalorder %s199_s10, %s1244_s15  ;;  %p1252_p2 = scmp.lt.s32.totalorder %s199_s10, %s199_s10 }
  0x11   : > { %p1400_p11 = pnand %p1696_p8, %p1205_p10  ;;  %p1253_p3 = scmp.lt.s32.totalorder %s1244_s15, %s1244_s15 }
  0x13   : > { %p1246_p13 = pneg %p1400_p11  ;;  %p1254_p6 = por %p1253_p3, %p1252_p2 }
  0x15   : > { %p1247_p0 = pnand %p1246_p13, %p1245_p12 }
  0x17   : > { %p1248_p1 = pneg %p1247_p0 }
  0x19   : > { %p1255_p7 = pnand %p1254_p6, %p1248_p1 }
  0x1b   : > { %1258 = shalt.err (!%p1255_p7)
}
  0x1c   : > { %s1306_s16 = smov [#allocation5]   ;;  %s1259_s17 = scalar_lea.vmem %s210_s13, 16 }
  0x1d   : > { %1208 = dma.vmem_to_smem (!%p1400_p11), %s199_s10, 16, %s1306_s16, [#allocation6]  }
  0x1e   : > { %p1260_p10 = scmp.ne.s32.totalorder %s210_s13, %s1259_s17  ;;  %p1267_p9 = scmp.lt.s32.totalorder %s210_s13, %s210_s13 }
  0x1f   : > { %p1268_p4 = scmp.lt.s32.totalorder %s1259_s17, %s1259_s17 }
  0x20   : > { %p1262_p8 = pnand %p1260_p10, %p1246_p13 }
  0x21   : > { %p1269_p12 = por %p1268_p4, %p1267_p9 }
  0x22   : > { %p1263_p5 = pneg %p1262_p8 }
  0x24   : > { %p1270_p0 = pnand %p1269_p12, %p1263_p5 }
  0x26   : > { %1273 = shalt.err (!%p1270_p0)
}
  0x27   : > { %s1307_s18 = smov [#allocation7]   ;;  %p1118_p1 = scmp.ge.s32.totalorder %s1304_s23, 2 }
  0x28   : > { %1211 = dma.vmem_to_smem (!%p1400_p11), %s210_s13, 16, %s1307_s18, [#allocation8]  }
  0x29   : > { %222 = sbr.rel (%p1118_p1) target bundleno = 58 (0x3a), region = 32  ;;  %p1702_p2 = scmp.ne.s32.totalorder (!%p1118_p1), %s1698_s29, 0 }
  0x2e   : > { %225 = sbr.rel (!%p1702_p2) target bundleno = 51 (0x33), region = 36  ;;  %s227_s19 = sand.u32 (%p1702_p2), 1, %s1300_s22  }
  0x2f   : > { %s1120_s20 = sshll.u32 (%p1702_p2), %s1304_s23, 3  ;;  %s1119_s26 = sshll.u32 (%p1702_p2), %s227_s19, 4 }
  0x30   : > { %s231_s9 = scalar_lea.vmem (%p1702_p2), %s1689_s0, %s1120_s20  ;;  %s229_s10 = scalar_lea.vmem (%p1702_p2), [#allocation3], %s1119_s26 }
  0x31   : > { %v262_v0 = vld [vmem:[%s231_s9] sm:$0xff] (%p1702_p2)  ;;  %v264_v1 = vld [vmem:[%s231_s9 + $0x10] sm:$0xff] (%p1702_p2) }
  0x32   : > { %263 = vst [vmem:[%s229_s10] sm:$0xff] (%p1702_p2), %v262_v0  ;;  %265 = vst [vmem:[%s229_s10 + $0x8] sm:$0xff] (%p1702_p2), %v264_v1 }
  0x33 PF: > { %p1703_p4 = scmp.ne.s32.totalorder %s1698_s29, 0 }
  0x34   : > { %s273_s11 = sand.u32 (%p1703_p4), 1, %s1300_s22   ;;  %s1122_s12 = sshll.u32 (%p1703_p4), %s1304_s23, 3 }
  0x35   : > { %271 = sbr.rel (!%p1703_p4) target bundleno = 58 (0x3a), region = 74  ;;  %s1121_s13 = sshll.u32 (%p1703_p4), %s273_s11, 4 }
  0x36   : > { %s277_s16 = scalar_lea.vmem (%p1703_p4), %s1690_s1, %s1122_s12  ;;  %s275_s17 = scalar_lea.vmem (%p1703_p4), [#allocation4], %s1121_s13 }
  0x37   : > { %v308_v2 = vld [vmem:[%s277_s16] sm:$0xff] (%p1703_p4)  ;;  %v310_v3 = vld [vmem:[%s277_s16 + $0x10] sm:$0xff] (%p1703_p4) }
  0x38   : > { %309 = vst [vmem:[%s275_s17] sm:$0xff] (%p1703_p4), %v308_v2  ;;  %311 = vst [vmem:[%s275_s17 + $0x8] sm:$0xff] (%p1703_p4), %v310_v3 }
  0x3a PF: > { %p1704_p5 = scmp.ne.s32.totalorder %s1700_s7, 0 }
  0x3b   : > { %s323_s29 = sand.u32 (!%p1704_p5), 1, %s1296_s21   ;;  %p1705_p8 = scmp.eq.s32.totalorder (!%p1704_p5), %s1360_s24, 0 }
  0x3c   : > { %320 = sbr.rel (%p1704_p5) target bundleno = 387 (0x183), region = 112  ;;  %s1428_s18 = sshll.u32 (!%p1704_p5), %s323_s29, 4 }
  0x3d   : > { %s325_s23 = scalar_lea.vmem (!%p1704_p5), [#allocation3], %s1428_s18  ;;  %s332_s19 = scalar_lea.vmem (!%p1704_p5), [#allocation4], %s1428_s18 }
  0x41   : > { %1287 = dma.done.wait (%p1705_p8), [#allocation6], 16   ;;  %p1706_p9 = pmov %p1705_p8 }
  0x42   : > { %p1707_p11 = pmov %p1705_p8 }
  0x43   : > { %1289 = vsyncadd (%p1706_p9), [#allocation6], 4294967280 }
  0x44   : > { %1291 = dma.done.wait (%p1707_p11), [#allocation8], 16   ;;  %p1708_p13 = pmov %p1705_p8 }
  0x46   : > { %1293 = vsyncadd (%p1708_p13), [#allocation8], 4294967280 }
  0x47   : > { %344 = sfence }
  0x48   : > { %vm887_vm0 = vcmask 588800   ;;  %s1155_s21 = sld [smem:[#allocation5 + $0x15]]  ;;  %v864_v4 = vld [vmem:[%s1693_s4] sm:$0xff]  ;;  %v1308_v5 = vmov 0   ;;  %v876_v7 = vld [vmem:[%s1694_s5 + $0x8] sm:$0x3] }
  0x49   : > { %s1156_s26 = sld [smem:[#allocation5 + $0x16]]  ;;  %1194 = vmatprep.mubr.msk.f32.mxu0 %vm887_vm0, %v864_v4  ;;  %1243 = vset.pattern.permute.xlu0 %v1308_v5  ;;  %v875_v6 = vld [vmem:[%s1694_s5] sm:$0xff]  ;;  %v1450_v8 = vld [vmem:[%s332_s19] sm:$0xff]  ;;  %vm392_vm1 = vcmask 1046528   ;;  %p1709_p3 = scmp.ne.s32.totalorder %s1699_s30, 0 }
  0x4a   : > { %s1157_s9 = sld [smem:[#allocation5 + $0x17]]  ;;  %879 = vperm.xlu0 %1243, %v875_v6   ;;  %v1454_v9 = vld [vmem:[%s332_s19 + $0x8] sm:$0x3]  ;;  %v1458_v10 = vld [vmem:[%s325_s23] sm:$0xff] }
  0x4b   : > { %s1158_s10 = sld [smem:[#allocation7 + $0x7]]  ;;  %v1460_v11 = vld [vmem:[%s325_s23 + $0x8] sm:$0x3] }
  0x4c   : > { %s1452_s13 = sld [smem:[#allocation5 + $0x12]] }
  0x4d   : > { %s1456_s14 = sld [smem:[#allocation5 + $0x13]] }
  0x4e   : > { %v807_v12 = vstv %s1155_s21  ;;  %884 = vperm.xlu0 %1243, %v876_v7   ;;  %s1468_s15 = sld [smem:[#allocation5 + $0x14]] }
  0x4f   : > { %v808_v13 = vmul.f32 %v807_v12, %v1458_v10  ;;  %v809_v14 = vmul.f32 %v807_v12, %v1460_v11  ;;  %v810_v15 = vstv %s1156_s26  ;;  %v830_v16 = vmul.f32 %v807_v12, %v1450_v8  ;;  %s1476_s16 = sld [smem:[#allocation7 + $0x6]] }
  0x50   : > { %v811_v17 = vmul.f32 %v810_v15, %v1450_v8  ;;  %v812_v18 = vmul.f32 %v810_v15, %v1454_v9  ;;  %v815_v19 = vstv %s1157_s9  ;;  %v831_v20 = vmul.f32 %v807_v12, %v1454_v9  ;;  %s1486_s17 = sld [smem:[#allocation5 + $0xf]] }
  0x51   : > { %v816_v21 = vmul.f32 %v815_v19, %v1458_v10  ;;  %v817_v22 = vmul.f32 %v815_v19, %v1460_v11  ;;  %v827_v23 = vstv %s1158_s10  ;;  %v832_v24 = vmul.f32 %v810_v15, %v1458_v10  ;;  %s1490_s29 = sld [smem:[#allocation5 + $0x10]] }
  0x52   : > { %v813_v25 = vadd.f32 %v811_v17, %v808_v13  ;;  %v814_v26 = vadd.f32 %v812_v18, %v809_v14  ;;  %v833_v27 = vmul.f32 %v810_v15, %v1460_v11  ;;  %v843_v28 = vmul.f32 %v815_v19, %v1450_v8  ;;  %s1496_s23 = sld [smem:[#allocation5 + $0x11]] }
  0x53   : > { %v820_v29 = vrot.slane %v816_v21, 1  ;;  %v821_v30 = vrot.slane %v817_v22, 1  ;;  %v836_v31 = vrot.slane %v832_v24, 1  ;;  %v844_v32 = vmul.f32 %v815_v19, %v1454_v9  ;;  %s1500_s19 = sld [smem:[#allocation7 + $0x5]] }
  0x54   : > { %v837_v33 = vrot.slane %v833_v27, 1  ;;  %v847_v34 = vrot.slane %v843_v28, 1  ;;  %v746_v35 = vstv %s1452_s13  ;;  %v749_v36 = vstv %s1456_s14  ;;  %s1510_s21 = sld [smem:[#allocation5 + $0xc]] }
  0x55   : > { %v822_v37 = vsel %vm392_vm1, %v820_v29, %v821_v30  ;;  %v826_v38 = vadd.f32 %v821_v30, %v814_v26  ;;  %v848_v39 = vrot.slane %v844_v32, 1  ;;  %v747_v40 = vmul.f32 %v746_v35, %v1458_v10  ;;  %s1519_s7 = sld [smem:[#allocation5 + $0xd]] }
  0x56   : > { %v825_v41 = vadd.f32 %v822_v37, %v813_v25  ;;  %v838_v42 = vsel %vm392_vm1, %v836_v31, %v837_v33  ;;  %v842_v43 = vadd.f32 %v837_v33, %v831_v20  ;;  %v748_v44 = vmul.f32 %v746_v35, %v1460_v11  ;;  %s1522_s20 = sld [smem:[#allocation5 + $0xe]] }
  0x57   : > { %v829_v45 = vadd.f32 %v827_v23, %v826_v38  ;;  %v841_v46 = vadd.f32 %v838_v42, %v830_v16  ;;  %v849_v47 = vsel %vm392_vm1, %v847_v34, %v848_v39  ;;  %v750_v48 = vmul.f32 %v749_v36, %v1450_v8  ;;  %s1530_s26 = sld [smem:[#allocation7 + $0x4]] }
  0x58   : > { %v828_v49 = vadd.f32 %v827_v23, %v825_v41  ;;  %v853_v50 = vadd.f32 %v848_v39, %v842_v43  ;;  %v751_v51 = vmul.f32 %v749_v36, %v1454_v9  ;;  %v754_v52 = vstv %s1468_s15  ;;  %s1540_s27 = sld [smem:[#allocation5 + $0x9]] }
  0x59   : > { %v852_v53 = vadd.f32 %v849_v47, %v841_v46  ;;  %v857_v54 = vmax.f32 %v829_v45, 0.0  ;;  %v752_v55 = vadd.f32 %v750_v48, %v747_v40  ;;  %v755_v56 = vmul.f32 %v754_v52, %v1458_v10  ;;  %s1544_s8 = sld [smem:[#allocation5 + $0xa]] }
  0x5a   : > { %v855_v57 = vadd.f32 %v853_v50, %v827_v23  ;;  %v856_v58 = vmax.f32 %v828_v49, 0.0  ;;  %v753_v59 = vadd.f32 %v751_v51, %v748_v44  ;;  %v756_v60 = vmul.f32 %v754_v52, %v1460_v11  ;;  %s1548_s9 = sld [smem:[#allocation5 + $0xb]] }
  0x5b   : > { %v854_v61 = vadd.f32 %v852_v53, %v827_v23  ;;  %v759_v62 = vrot.slane %v755_v56, 1  ;;  %v766_v63 = vstv %s1476_s16  ;;  %v769_v0 = vmul.f32 %v746_v35, %v1450_v8  ;;  %s1551_s10 = sld [smem:[#allocation7 + $0x3]] }
  0x5c   : > { %v859_v1 = vmax.f32 %v855_v57, 0.0  ;;  %v760_v2 = vrot.slane %v756_v60, 1  ;;  %v770_v3 = vmul.f32 %v746_v35, %v1454_v9  ;;  %v771_v4 = vmul.f32 %v749_v36, %v1458_v10  ;;  %s1569_s11 = sld [smem:[#allocation5 + $0x6]] }
  0x5d   : > { %v858_v5 = vmax.f32 %v854_v61, 0.0  ;;  %v772_v6 = vmul.f32 %v749_v36, %v1460_v11  ;;  %v782_v7 = vmul.f32 %v754_v52, %v1450_v8  ;;  %v783_v12 = vmul.f32 %v754_v52, %v1454_v9  ;;  %s1577_s12 = sld [smem:[#allocation5 + $0x7]] }
  0x5e   : > { %v861_v13 = vmax.f32 %v857_v54, %v859_v1  ;;  %v761_v14 = vsel %vm392_vm1, %v759_v62, %v760_v2  ;;  %v765_v15 = vadd.f32 %v760_v2, %v753_v59  ;;  %v775_v16 = vrot.slane %v771_v4, 1  ;;  %s1580_s13 = sld [smem:[#allocation5 + $0x8]] }
  0x5f   : > { %v860_v17 = vmax.f32 %v856_v58, %v858_v5  ;;  %v764_v18 = vadd.f32 %v761_v14, %v752_v55  ;;  %v776_v19 = vrot.slane %v772_v6, 1  ;;  %v786_v20 = vrot.slane %v782_v7, 1  ;;  %s1586_s14 = sld [smem:[#allocation7 + $0x2]] }
  0x60   : > { %863 = vst [vmem:[#allocation2 + $0x47] sm:$0x1] %v861_v13  ;;  %v768_v21 = vadd.f32 %v766_v63, %v765_v15  ;;  %v787_v22 = vrot.slane %v783_v12, 1  ;;  %v685_v23 = vstv %s1486_s17  ;;  %v688_v24 = vstv %s1490_s29  ;;  %s1596_s15 = sld [smem:[#allocation5 + $0x3]] }
  0x61   : > { %862 = vst [vmem:[#allocation2 + $0x3f] sm:$0xff] %v860_v17  ;;  %v767_v25 = vadd.f32 %v766_v63, %v764_v18  ;;  %v777_v26 = vsel %vm392_vm1, %v775_v16, %v776_v19  ;;  %v781_v27 = vadd.f32 %v776_v19, %v770_v3  ;;  %v686_v28 = vmul.f32 %v685_v23, %v1458_v10  ;;  %s1600_s16 = sld [smem:[#allocation5 + $0x4]] }
  0x62   : > { %v780_v29 = vadd.f32 %v777_v26, %v769_v0  ;;  %v788_v30 = vsel %vm392_vm1, %v786_v20, %v787_v22  ;;  %v796_v31 = vmax.f32 %v768_v21, 0.0  ;;  %v687_v32 = vmul.f32 %v685_v23, %v1460_v11  ;;  %s1610_s17 = sld [smem:[#allocation5 + $0x5]] }
  0x63   : > { %v792_v33 = vadd.f32 %v787_v22, %v781_v27  ;;  %v795_v34 = vmax.f32 %v767_v25, 0.0  ;;  %v689_v35 = vmul.f32 %v688_v24, %v1450_v8  ;;  %v690_v36 = vmul.f32 %v688_v24, %v1454_v9  ;;  %s1614_s29 = sld [smem:[#allocation7 + $0x1]] }
  0x64   : > { %v791_v37 = vadd.f32 %v788_v30, %v780_v29  ;;  %v693_v38 = vstv %s1496_s23  ;;  %v705_v39 = vstv %s1500_s19  ;;  %v708_v40 = vmul.f32 %v685_v23, %v1450_v8  ;;  %s1624_s23 = sld [smem:[#allocation5]] }
  0x65   : > { %v794_v41 = vadd.f32 %v792_v33, %v766_v63  ;;  %v691_v42 = vadd.f32 %v689_v35, %v686_v28  ;;  %v692_v43 = vadd.f32 %v690_v36, %v687_v32  ;;  %v694_v44 = vmul.f32 %v693_v38, %v1458_v10  ;;  %s1633_s19 = sld [smem:[#allocation5 + $0x1]] }
  0x66   : > { %v793_v45 = vadd.f32 %v791_v37, %v766_v63  ;;  %v695_v46 = vmul.f32 %v693_v38, %v1460_v11  ;;  %v709_v47 = vmul.f32 %v685_v23, %v1454_v9  ;;  %v710_v48 = vmul.f32 %v688_v24, %v1458_v10 }
  0x67   : > { %v798_v49 = vmax.f32 %v794_v41, 0.0  ;;  %v698_v50 = vrot.slane %v694_v44, 1  ;;  %v711_v51 = vmul.f32 %v688_v24, %v1460_v11  ;;  %v721_v52 = vmul.f32 %v693_v38, %v1450_v8 }
  0x68   : > { %v874_v53 = vld [vmem:[#allocation2 + $0x40] sm:$0xff]  ;;  %v797_v54 = vmax.f32 %v793_v45, 0.0  ;;  %v699_v55 = vrot.slane %v695_v46, 1  ;;  %v714_v56 = vrot.slane %v710_v48, 1  ;;  %v722_v57 = vmul.f32 %v693_v38, %v1454_v9 }
  0x69   : > { %1176 = vmatprep.subr.mxu0 %v874_v53  ;;  %v800_v58 = vmax.f32 %v796_v31, %v798_v49  ;;  %v715_v59 = vrot.slane %v711_v51, 1  ;;  %v725_v60 = vrot.slane %v721_v52, 1  ;;  %v624_v61 = vstv %s1510_s21  ;;  %s1636_s21 = sld [smem:[#allocation5 + $0x2]] }
  0x6a   : > { %1177 = vmatpush3.msra.mxu0 %v874_v53  ;;  %v799_v62 = vmax.f32 %v795_v34, %v797_v54  ;;  %v700_v63 = vsel %vm392_vm1, %v698_v50, %v699_v55  ;;  %v704_v0 = vadd.f32 %v699_v55, %v692_v43  ;;  %v726_v1 = vrot.slane %v722_v57, 1 }
  0x6b   : > { %802 = vst [vmem:[#allocation2 + $0x3e] sm:$0x1] %v800_v58  ;;  %v703_v2 = vadd.f32 %v700_v63, %v691_v42  ;;  %v716_v3 = vsel %vm392_vm1, %v714_v56, %v715_v59  ;;  %v720_v4 = vadd.f32 %v715_v59, %v709_v47  ;;  %v625_v5 = vmul.f32 %v624_v61, %v1458_v10 }
  0x6c   : > { %801 = vst [vmem:[#allocation2 + $0x36] sm:$0xff] %v799_v62  ;;  %v707_v6 = vadd.f32 %v705_v39, %v704_v0  ;;  %v719_v7 = vadd.f32 %v716_v3, %v708_v40  ;;  %v727_v12 = vsel %vm392_vm1, %v725_v60, %v726_v1  ;;  %v626_v13 = vmul.f32 %v624_v61, %v1460_v11 }
  0x6d   : > { %v706_v14 = vadd.f32 %v705_v39, %v703_v2  ;;  %v731_v15 = vadd.f32 %v726_v1, %v720_v4  ;;  %v627_v16 = vstv %s1519_s7  ;;  %v632_v17 = vstv %s1522_s20  ;;  %s1641_s7 = sld [smem:[#allocation7]] }
  0x6e   : > { %v730_v18 = vadd.f32 %v727_v12, %v719_v7  ;;  %v735_v19 = vmax.f32 %v707_v6, 0.0  ;;  %v628_v20 = vmul.f32 %v627_v16, %v1450_v8  ;;  %v629_v21 = vmul.f32 %v627_v16, %v1454_v9 }
  0x6f   : > { %v733_v22 = vadd.f32 %v731_v15, %v705_v39  ;;  %v734_v23 = vmax.f32 %v706_v14, 0.0  ;;  %v633_v24 = vmul.f32 %v632_v17, %v1458_v10  ;;  %v634_v25 = vmul.f32 %v632_v17, %v1460_v11 }
  0x70   : > { %v732_v26 = vadd.f32 %v730_v18, %v705_v39  ;;  %v630_v27 = vadd.f32 %v628_v20, %v625_v5  ;;  %v631_v28 = vadd.f32 %v629_v21, %v626_v13  ;;  %v644_v29 = vstv %s1530_s26 }
  0x71   : > { %v737_v30 = vmax.f32 %v733_v22, 0.0  ;;  %v637_v31 = vrot.slane %v633_v24, 1  ;;  %v638_v32 = vrot.slane %v634_v25, 1  ;;  %v647_v33 = vmul.f32 %v624_v61, %v1450_v8 }
  0x72   : > { %v736_v34 = vmax.f32 %v732_v26, 0.0  ;;  %v648_v35 = vmul.f32 %v624_v61, %v1454_v9  ;;  %v649_v36 = vmul.f32 %v627_v16, %v1458_v10  ;;  %v650_v37 = vmul.f32 %v627_v16, %v1460_v11 }
  0x73   : > { %v873_v38 = vld [vmem:[#allocation2 + $0x38] sm:$0xff]  ;;  %v739_v39 = vmax.f32 %v735_v19, %v737_v30  ;;  %v639_v40 = vsel %vm392_vm1, %v637_v31, %v638_v32  ;;  %v643_v41 = vadd.f32 %v638_v32, %v631_v28  ;;  %v660_v42 = vmul.f32 %v632_v17, %v1450_v8 }
  0x74   : > { %1178 = vmatprep.subr.mxu0 %v873_v38  ;;  %v738_v43 = vmax.f32 %v734_v23, %v736_v34  ;;  %v642_v44 = vadd.f32 %v639_v40, %v630_v27  ;;  %v653_v45 = vrot.slane %v649_v36, 1  ;;  %v654_v46 = vrot.slane %v650_v37, 1 }
  0x75   : > { %1179 = vmatpush3.msra.mxu0 %v873_v38  ;;  %741 = vst [vmem:[#allocation2 + $0x35] sm:$0x1] %v739_v39  ;;  %v646_v47 = vadd.f32 %v644_v29, %v643_v41  ;;  %v661_v48 = vmul.f32 %v632_v17, %v1454_v9  ;;  %v664_v49 = vrot.slane %v660_v42, 1  ;;  %v563_v50 = vstv %s1540_s27  ;;  %s370_s27 = scalar_lea.vmem [#allocation9], %s1428_s18 }
  0x76   : > { %740 = vst [vmem:[#allocation2 + $0x2d] sm:$0xff] %v738_v43  ;;  %v645_v51 = vadd.f32 %v644_v29, %v642_v44  ;;  %v655_v52 = vsel %vm392_vm1, %v653_v45, %v654_v46  ;;  %v659_v53 = vadd.f32 %v654_v46, %v648_v35  ;;  %v564_v54 = vmul.f32 %v563_v50, %v1458_v10 }
  0x77   : > { %v658_v55 = vadd.f32 %v655_v52, %v647_v33  ;;  %v665_v56 = vrot.slane %v661_v48, 1  ;;  %v674_v57 = vmax.f32 %v646_v47, 0.0  ;;  %v565_v58 = vmul.f32 %v563_v50, %v1460_v11 }
  0x78   : > { %v673_v59 = vmax.f32 %v645_v51, 0.0  ;;  %v566_v60 = vstv %s1544_s8  ;;  %v571_v61 = vstv %s1548_s9  ;;  %v1567_v62 = vstv %s1551_s10  ;;  %s1162_s8 = sshll.u32 (%p1709_p3), %s1360_s24, 3 }
  0x79   : > { %v666_v63 = vsel %vm392_vm1, %v664_v49, %v665_v56  ;;  %v670_v0 = vadd.f32 %v665_v56, %v659_v53  ;;  %v567_v1 = vmul.f32 %v566_v60, %v1450_v8  ;;  %v568_v2 = vmul.f32 %v566_v60, %v1454_v9 }
  0x7a   : > { %v669_v3 = vadd.f32 %v666_v63, %v658_v55  ;;  %v572_v4 = vmul.f32 %v571_v61, %v1458_v10  ;;  %v573_v5 = vmul.f32 %v571_v61, %v1460_v11  ;;  %v586_v6 = vmul.f32 %v563_v50, %v1450_v8 }
  0x7b   : > { %v672_v7 = vadd.f32 %v670_v0, %v644_v29  ;;  %v569_v12 = vadd.f32 %v567_v1, %v564_v54  ;;  %v570_v13 = vadd.f32 %v568_v2, %v565_v58  ;;  %v587_v14 = vmul.f32 %v563_v50, %v1454_v9 }
  0x7c   : > { %v671_v15 = vadd.f32 %v669_v3, %v644_v29  ;;  %v576_v16 = vrot.slane %v572_v4, 1  ;;  %v577_v17 = vrot.slane %v573_v5, 1  ;;  %v588_v18 = vmul.f32 %v566_v60, %v1458_v10 }
  0x7d   : > { %v872_v19 = vld [vmem:[#allocation2 + $0x30] sm:$0xff]  ;;  %v676_v20 = vmax.f32 %v672_v7, 0.0  ;;  %v589_v21 = vmul.f32 %v566_v60, %v1460_v11  ;;  %v599_v22 = vmul.f32 %v571_v61, %v1450_v8  ;;  %v600_v23 = vmul.f32 %v571_v61, %v1454_v9 }
  0x7e   : > { %1180 = vmatprep.subr.mxu0 %v872_v19  ;;  %v675_v24 = vmax.f32 %v671_v15, 0.0  ;;  %v578_v25 = vsel %vm392_vm1, %v576_v16, %v577_v17  ;;  %v582_v26 = vadd.f32 %v577_v17, %v570_v13  ;;  %v592_v27 = vrot.slane %v588_v18, 1 }
  0x7f   : > { %1181 = vmatpush3.msra.mxu0 %v872_v19  ;;  %v678_v28 = vmax.f32 %v674_v57, %v676_v20  ;;  %v581_v29 = vadd.f32 %v578_v25, %v569_v12  ;;  %v593_v30 = vrot.slane %v589_v21, 1  ;;  %v603_v31 = vrot.slane %v599_v22, 1 }
  0x80   : > { %v677_v32 = vmax.f32 %v673_v59, %v675_v24  ;;  %v585_v33 = vadd.f32 %v1567_v62, %v582_v26  ;;  %v604_v34 = vrot.slane %v600_v23, 1  ;;  %v502_v35 = vstv %s1569_s11  ;;  %s979_s11 = scalar_lea.vmem (%p1709_p3), %s1695_s6, %s1162_s8 }
  0x81   : > { %680 = vst [vmem:[#allocation2 + $0x2c] sm:$0x1] %v678_v28  ;;  %v584_v36 = vadd.f32 %v1567_v62, %v581_v29  ;;  %v594_v37 = vsel %vm392_vm1, %v592_v27, %v593_v30  ;;  %v598_v38 = vadd.f32 %v593_v30, %v587_v14  ;;  %v503_v39 = vmul.f32 %v502_v35, %v1458_v10 }
  0x82   : > { %679 = vst [vmem:[#allocation2 + $0x24] sm:$0xff] %v677_v32  ;;  %v597_v40 = vadd.f32 %v594_v37, %v586_v6  ;;  %v605_v41 = vsel %vm392_vm1, %v603_v31, %v604_v34  ;;  %v613_v42 = vmax.f32 %v585_v33, 0.0  ;;  %v504_v43 = vmul.f32 %v502_v35, %v1460_v11 }
  0x83   : > { %v609_v44 = vadd.f32 %v604_v34, %v598_v38  ;;  %v612_v45 = vmax.f32 %v584_v36, 0.0  ;;  %v505_v46 = vstv %s1577_s12  ;;  %v510_v47 = vstv %s1580_s13 }
  0x84   : > { %v608_v48 = vadd.f32 %v605_v41, %v597_v40  ;;  %v506_v49 = vmul.f32 %v505_v46, %v1450_v8  ;;  %v507_v50 = vmul.f32 %v505_v46, %v1454_v9  ;;  %v511_v51 = vmul.f32 %v510_v47, %v1458_v10 }
  0x85   : > { %v611_v52 = vadd.f32 %v609_v44, %v1567_v62  ;;  %v512_v53 = vmul.f32 %v510_v47, %v1460_v11  ;;  %v522_v54 = vstv %s1586_s14  ;;  %v525_v55 = vmul.f32 %v502_v35, %v1450_v8 }
  0x86   : > { %v610_v56 = vadd.f32 %v608_v48, %v1567_v62  ;;  %v508_v57 = vadd.f32 %v506_v49, %v503_v39  ;;  %v509_v58 = vadd.f32 %v507_v50, %v504_v43  ;;  %v515_v59 = vrot.slane %v511_v51, 1 }
  0x87   : > { %v615_v60 = vmax.f32 %v611_v52, 0.0  ;;  %v516_v61 = vrot.slane %v512_v53, 1  ;;  %v526_v63 = vmul.f32 %v502_v35, %v1454_v9  ;;  %v527_v0 = vmul.f32 %v505_v46, %v1458_v10 }
  0x88   : > { %v614_v1 = vmax.f32 %v610_v56, 0.0  ;;  %v528_v2 = vmul.f32 %v505_v46, %v1460_v11  ;;  %v538_v3 = vmul.f32 %v510_v47, %v1450_v8  ;;  %v539_v62 = vmul.f32 %v510_v47, %v1454_v9 }
  0x89   : > { %v871_v4 = vld [vmem:[#allocation2 + $0x28] sm:$0xff]  ;;  %v617_v5 = vmax.f32 %v613_v42, %v615_v60  ;;  %v517_v6 = vsel %vm392_vm1, %v515_v59, %v516_v61  ;;  %v521_v7 = vadd.f32 %v516_v61, %v509_v58  ;;  %v531_v12 = vrot.slane %v527_v0, 1 }
  0x8a   : > { %1182 = vmatprep.subr.mxu0 %v871_v4  ;;  %v616_v13 = vmax.f32 %v612_v45, %v614_v1  ;;  %v520_v14 = vadd.f32 %v517_v6, %v508_v57  ;;  %v532_v15 = vrot.slane %v528_v2, 1  ;;  %v542_v16 = vrot.slane %v538_v3, 1 }
  0x8b   : > { %1183 = vmatpush3.msra.mxu0 %v871_v4  ;;  %619 = vst [vmem:[#allocation2 + $0x23] sm:$0x1] %v617_v5  ;;  %v524_v17 = vadd.f32 %v522_v54, %v521_v7  ;;  %v543_v18 = vrot.slane %v539_v62, 1  ;;  %v441_v19 = vstv %s1596_s15  ;;  %v444_v20 = vstv %s1600_s16 }
  0x8c   : > { %618 = vst [vmem:[#allocation2 + $0x1b] sm:$0xff] %v616_v13  ;;  %v523_v21 = vadd.f32 %v522_v54, %v520_v14  ;;  %v533_v22 = vsel %vm392_vm1, %v531_v12, %v532_v15  ;;  %v537_v23 = vadd.f32 %v532_v15, %v526_v63  ;;  %v442_v24 = vmul.f32 %v441_v19, %v1458_v10 }
  0x8d   : > { %v536_v25 = vadd.f32 %v533_v22, %v525_v55  ;;  %v544_v26 = vsel %vm392_vm1, %v542_v16, %v543_v18  ;;  %v552_v27 = vmax.f32 %v524_v17, 0.0  ;;  %v443_v28 = vmul.f32 %v441_v19, %v1460_v11 }
  0x8e   : > { %v548_v29 = vadd.f32 %v543_v18, %v537_v23  ;;  %v551_v30 = vmax.f32 %v523_v21, 0.0  ;;  %v445_v31 = vmul.f32 %v444_v20, %v1450_v8  ;;  %v446_v32 = vmul.f32 %v444_v20, %v1454_v9 }
  0x8f   : > { %v547_v33 = vadd.f32 %v544_v26, %v536_v25  ;;  %v449_v34 = vstv %s1610_s17  ;;  %v461_v35 = vstv %s1614_s29  ;;  %v464_v36 = vmul.f32 %v441_v19, %v1450_v8 }
  0x90   : > { %v550_v37 = vadd.f32 %v548_v29, %v522_v54  ;;  %v447_v38 = vadd.f32 %v445_v31, %v442_v24  ;;  %v448_v39 = vadd.f32 %v446_v32, %v443_v28  ;;  %v450_v40 = vmul.f32 %v449_v34, %v1458_v10 }
  0x91   : > { %v549_v41 = vadd.f32 %v547_v33, %v522_v54  ;;  %v451_v42 = vmul.f32 %v449_v34, %v1460_v11  ;;  %v465_v43 = vmul.f32 %v441_v19, %v1454_v9  ;;  %v466_v44 = vmul.f32 %v444_v20, %v1458_v10 }
  0x92   : > { %v554_v45 = vmax.f32 %v550_v37, 0.0  ;;  %v454_v46 = vrot.slane %v450_v40, 1  ;;  %v467_v47 = vmul.f32 %v444_v20, %v1460_v11  ;;  %v477_v48 = vmul.f32 %v449_v34, %v1450_v8 }
  0x93   : > { %v870_v49 = vld [vmem:[#allocation2 + $0x20] sm:$0xff]  ;;  %v553_v50 = vmax.f32 %v549_v41, 0.0  ;;  %v455_v51 = vrot.slane %v451_v42, 1  ;;  %v470_v52 = vrot.slane %v466_v44, 1  ;;  %v478_v53 = vmul.f32 %v449_v34, %v1454_v9 }
  0x94   : > { %1184 = vmatprep.subr.mxu0 %v870_v49  ;;  %v556_v54 = vmax.f32 %v552_v27, %v554_v45  ;;  %v471_v55 = vrot.slane %v467_v47, 1  ;;  %v481_v56 = vrot.slane %v477_v48, 1  ;;  %v379_v57 = vstv %s1624_s23 }
  0x95   : > { %1185 = vmatpush3.msra.mxu0 %v870_v49  ;;  %v555_v58 = vmax.f32 %v551_v30, %v553_v50  ;;  %v456_v59 = vsel %vm392_vm1, %v454_v46, %v455_v51  ;;  %v460_v60 = vadd.f32 %v455_v51, %v448_v39  ;;  %v482_v61 = vrot.slane %v478_v53, 1 }
  0x96   : > { %558 = vst [vmem:[#allocation2 + $0x1a] sm:$0x1] %v556_v54  ;;  %v459_v63 = vadd.f32 %v456_v59, %v447_v38  ;;  %v472_v0 = vsel %vm392_vm1, %v470_v52, %v471_v55  ;;  %v476_v1 = vadd.f32 %v471_v55, %v465_v43  ;;  %v381_v2 = vmul.f32 %v379_v57, %v1460_v11 }
  0x97   : > { %557 = vst [vmem:[#allocation2 + $0x12] sm:$0xff] %v555_v58  ;;  %v463_v3 = vadd.f32 %v461_v35, %v460_v60  ;;  %v475_v62 = vadd.f32 %v472_v0, %v464_v36  ;;  %v483_v4 = vsel %vm392_vm1, %v481_v56, %v482_v61  ;;  %v382_v5 = vstv %s1633_s19  ;;  %v865_v60 = vld [vmem:[%s1693_s4 + $0x8] sm:$0x3] }
  0x98   : > { %v462_v6 = vadd.f32 %v461_v35, %v459_v63  ;;  %v487_v7 = vadd.f32 %v482_v61, %v476_v1  ;;  %v384_v12 = vmul.f32 %v382_v5, %v1454_v9  ;;  %v387_v13 = vstv %s1636_s21 }
  0x99   : > { %v486_v14 = vadd.f32 %v483_v4, %v475_v62  ;;  %v491_v15 = vmax.f32 %v463_v3, 0.0  ;;  %v389_v16 = vmul.f32 %v387_v13, %v1460_v11  ;;  %v400_v17 = vstv %s1641_s7 }
  0x9a   : > { %v489_v18 = vadd.f32 %v487_v7, %v461_v35  ;;  %v490_v19 = vmax.f32 %v462_v6, 0.0  ;;  %v386_v20 = vadd.f32 %v384_v12, %v381_v2  ;;  %v404_v21 = vmul.f32 %v379_v57, %v1454_v9 }
  0x9b   : > { %v488_v22 = vadd.f32 %v486_v14, %v461_v35  ;;  %v394_v23 = vrot.slane %v389_v16, 1  ;;  %v406_v24 = vmul.f32 %v382_v5, %v1460_v11  ;;  %v417_v25 = vmul.f32 %v387_v13, %v1454_v9 }
  0x9c   : > { %v493_v26 = vmax.f32 %v489_v18, 0.0  ;;  %v380_v27 = vmul.f32 %v379_v57, %v1458_v10  ;;  %v383_v28 = vmul.f32 %v382_v5, %v1450_v8  ;;  %v388_v29 = vmul.f32 %v387_v13, %v1458_v10 }
  0x9d   : > { %v492_v30 = vmax.f32 %v488_v22, 0.0  ;;  %v399_v31 = vadd.f32 %v394_v23, %v386_v20  ;;  %v410_v32 = vrot.slane %v406_v24, 1  ;;  %v421_v33 = vrot.slane %v417_v25, 1 }
  0x9e   : > { %v869_v34 = vld [vmem:[#allocation2 + $0x18] sm:$0xff]  ;;  %v495_v36 = vmax.f32 %v491_v15, %v493_v26  ;;  %v385_v37 = vadd.f32 %v383_v28, %v380_v27  ;;  %v393_v35 = vrot.slane %v388_v29, 1  ;;  %v405_v9 = vmul.f32 %v382_v5, %v1458_v10 }
  0x9f   : > { %1186 = vmatprep.subr.mxu0 %v869_v34  ;;  %v494_v38 = vmax.f32 %v490_v19, %v492_v30  ;;  %v402_v11 = vadd.f32 %v400_v17, %v399_v31  ;;  %v415_v39 = vadd.f32 %v410_v32, %v404_v21  ;;  %v403_v41 = vmul.f32 %v379_v57, %v1450_v8 }
  0xa0   : > { %1187 = vmatpush3.msra.mxu0 %v869_v34  ;;  %497 = vst [vmem:[#allocation2 + $0x11] sm:$0x1] %v495_v36  ;;  %v395_v40 = vsel %vm392_vm1, %v393_v35, %v394_v23  ;;  %v416_v42 = vmul.f32 %v387_v13, %v1450_v8  ;;  %v409_v45 = vrot.slane %v405_v9, 1 }
  0xa1   : > { %496 = vst [vmem:[#allocation2 + $0x9] sm:$0xff] %v494_v38  ;;  %v426_v43 = vadd.f32 %v421_v33, %v415_v39  ;;  %v398_v44 = vadd.f32 %v395_v40, %v385_v37  ;;  %v430_v48 = vmax.f32 %v402_v11, 0.0 }
  0xa2   : > { %v420_v46 = vrot.slane %v416_v42, 1  ;;  %v411_v49 = vsel %vm392_vm1, %v409_v45, %v410_v32 }
  0xa3   : > { %v428_v47 = vadd.f32 %v426_v43, %v400_v17  ;;  %v401_v50 = vadd.f32 %v400_v17, %v398_v44  ;;  %v414_v51 = vadd.f32 %v411_v49, %v403_v41 }
  0xa4   : > { %v422_v10 = vsel %vm392_vm1, %v420_v46, %v421_v33 }
  0xa5   : > { %v432_v52 = vmax.f32 %v428_v47, 0.0  ;;  %v425_v53 = vadd.f32 %v422_v10, %v414_v51  ;;  %v429_v57 = vmax.f32 %v401_v50, 0.0 }
  0xa7   : > { %v434_v54 = vmax.f32 %v430_v48, %v432_v52  ;;  %v427_v56 = vadd.f32 %v425_v53, %v400_v17 }
  0xa8   : > { %v868_v55 = vld [vmem:[#allocation2 + $0x10] sm:$0xff] }
  0xa9   : > { %1188 = vmatprep.subr.mxu0 %v868_v55  ;;  %436 = vst [vmem:[#allocation2 + $0x8] sm:$0x1] %v434_v54  ;;  %v431_v8 = vmax.f32 %v427_v56, 0.0 }
  0xaa   : > { %1189 = vmatpush3.msra.mxu0 %v868_v55 }
  0xab   : > { %v433_v58 = vmax.f32 %v429_v57, %v431_v8 }
  0xb0   : > { %v867_v59 = vld [vmem:[#allocation2 + $0x8] sm:$0xff] }
  0xb1   : > { %1190 = vmatprep.subr.mxu0 %v867_v59 }
  0xb2   : > { %1191 = vmatpush3.msra.mxu0 %v867_v59 }
  0xb3   : > { %1192 = vmatprep.subr.mxu0 %v433_v58 }
  0xb4   : > { %1193 = vmatpush3.msra.mxu0 %v433_v58 }
  0xb5   : > { %1195 = vmatmul.mubr.msk.f32.vlgmr.msra.gmra.mxu0 %vm887_vm0, %v865_v60 }
  0xc5   : > { %v880_v61 = vpop.permute.xlu0 %879 }
  0xc9   : > { %v885_v63 = vpop.permute.xlu0 %884 }
 0x175   : > { %v1196_v0 = vpop.f32.mrf.mxu0 }
 0x176   : > { %v966_v1 = vadd.f32 %v1196_v0, %v885_v63  ;;  %977 = sbr.rel (!%p1709_p3) target bundleno = 387 (0x183), region = 132 }
 0x177   : > { %v960_v2 = vpop.f32.mrf.mxu0 }
 0x178   : > { %970 = vst [vmem:[%s370_s27 + $0x8] sm:$0x3] %v966_v1  ;;  %v961_v3 = vadd.f32 %v960_v2, %v880_v61 }
 0x17a   : > { %969 = vst [vmem:[%s370_s27] sm:$0xff] %v961_v3 }
 0x17f   : > { %v1012_v4 = vld [vmem:[%s370_s27 + $0x8] sm:$0xff] }
 0x180   : > { %1013 = vst [vmem:[%s979_s11 + $0x10] sm:$0xff] %v1012_v4 }
 0x181   : > { %v1010_v62 = vld [vmem:[%s370_s27] sm:$0xff] }
 0x182   : > { %1011 = vst [vmem:[%s979_s11] sm:$0xff] %v1010_v62 }
 0x183 PF: > { %p15_p6 = scmp.ge.s32.totalorder %s1363_s25, 4   ;;  %s1710_s21 = smov %s1300_s22 }
 0x184   : > { %s1711_s22 = smov %s1373_s28  ;;  %s1712_s23 = smov %s1363_s25 }
 0x185   :  { %17 = sbr.rel (!%p15_p6) target bundleno = 3 (0x3), region = 210 }
 0x18a   :  { %1029 = vsyncpa [#allocation6], 1 }
 0x18b   :  { %1031 = vsyncpa [#allocation6 + $0x1], 1 }
 0x18c   :  { %1032 = vsyncpa [#allocation8], 1 }

</bundles_post_ra>
